<compile_context>
chip_gen: v6e
topology: v6e:2x2x1
jax: 0.10.0
libtpu: 0.0.40
codegen_flags: <defaults>
</compile_context>

<pallas_src>
import math

import jax
import jax.numpy as jnp
from jax.experimental import pallas as pl
from jax.experimental.pallas import tpu as pltpu

_LANE = 128      # lane width (last dim)
_SUBLANE = 8     # f32 sublane width (second-to-last dim)

# Conservative cross-generation VMEM budgets:
#   physical VMEM: 128 MiB (v5e/v6e), 64 MiB (v7x); default scoped: 16/32/32 MiB.
# We keep the kernel's working set <= ~40 MiB and never request a scoped limit
# above 48 MiB, which is safe on every generation.
_VMEM_BUDGET = 40 << 20
_VMEM_LIMIT_CAP = 48 << 20


def _round_up(n, m):
    return ((n + m - 1) // m) * m


def _vmem_limit(need_bytes):
    return int(min(max(need_bytes + (8 << 20), 16 << 20), _VMEM_LIMIT_CAP))


def _make_decoder_kernel(n_layers):
    """Fused kernel: x -> [Linear + ReLU] * n_layers -> out, all in VMEM/vregs."""

    def kernel(*refs):
        x_ref = refs[0]
        o_ref = refs[-1]
        h = x_ref[...].astype(jnp.float32)
        for i in range(n_layers):
            w = refs[1 + 2 * i][...]          # (K_i, N_i)  (hidden N_i padded to 128)
            b = refs[2 + 2 * i][...]          # (1, N_i)    broadcasts over rows
            h = jnp.dot(h, w, preferred_element_type=jnp.float32,
                        precision=jax.lax.Precision.HIGHEST)
            h = jnp.maximum(h + b, 0.0)       # ReLU after every Linear (matches module)
        o_ref[...] = h.astype(o_ref.dtype)

    return kernel


def prepare_decoder_params(params):
    """One-time (init-time) packing of the Linear params for the kernel.

    * Hidden output dims are zero-padded to a multiple of 128 (lane-dense MXU
      tiles).  ReLU(0 + 0) = 0 and padded next-layer weight rows are zero, so
      the padded columns contribute nothing -> results are bit-identical to
      the unpadded math.
    * The first layer's input dim and the last layer's output dim stay
      unpadded, so the kernel consumes x at (B, K) and writes (B, N_out)
      directly (no pad/slice HBM copies around the kernel).
    """
    n_layers = len(params)
    prepared = []
    prev_out = params[0][0].shape[0]          # = K of x, kept unpadded
    for li, (w, b) in enumerate(params):
        k, n = w.shape
        n_pad = n if li == n_layers - 1 else _round_up(n, _LANE)
        wp = jnp.zeros((prev_out, n_pad), jnp.float32).at[:k, :n].set(
            w.astype(jnp.float32))
        bp = jnp.zeros((1, n_pad), jnp.float32).at[0, :n].set(b.astype(jnp.float32))
        prepared.append((wp, bp))
        prev_out = n_pad
    return prepared


def decoder_forward(x, prepared_params, *, gridded_threshold=256):
    """relu(...relu(relu(x @ W0 + b0) @ W1 + b1)...) as a single Pallas call."""
    n_layers = len(prepared_params)
    B, K = x.shape
    N_out = prepared_params[-1][0].shape[1]
    itemsize = 4

    max_w = max([K] + [int(wp.shape[1]) for wp, _ in prepared_params])
    param_bytes = sum(int(wp.size) * itemsize + int(bp.size) * itemsize
                      for wp, bp in prepared_params)
    flat = [t for wb in prepared_params for t in wb]
    kernel = _make_decoder_kernel(n_layers)
    n_in = 1 + 2 * n_layers
    flops = 2 * B * sum(int(wp.shape[0]) * int(wp.shape[1])
                        for wp, _ in prepared_params)

    # ---- small-batch path: single un-gridded call, everything resident ----
    small_need = (B * K + B * N_out + 2 * B * max_w) * itemsize + param_bytes
    if B <= gridded_threshold and small_need <= _VMEM_BUDGET:
        bytes_accessed = (B * K + B * N_out) * itemsize + param_bytes
        return pl.pallas_call(
            kernel,
            out_shape=jax.ShapeDtypeStruct((B, N_out), x.dtype),
            in_specs=[pl.BlockSpec(memory_space=pltpu.MemorySpace.VMEM)] * n_in,
            out_specs=pl.BlockSpec(memory_space=pltpu.MemorySpace.VMEM),
            compiler_params=pltpu.CompilerParams(
                vmem_limit_bytes=_vmem_limit(small_need)),
            cost_estimate=pl.CostEstimate(
                flops=flops, transcendentals=0, bytes_accessed=bytes_accessed),
        )(x, *flat)

    # ---- large-batch path: batch-tiled "parallel" grid, weights resident ----
    B8 = _round_up(B, _SUBLANE)
    x_in = x if B8 == B else jnp.pad(x, ((0, B8 - B), (0, 0)))

    def grid_need(tm):
        # x/out blocks double-buffered + resident weights (default double
        # buffering) + live f32 activation inside the body.
        return (2 * tm * (K + N_out) * itemsize
                + 2 * param_bytes
                + 2 * tm * max_w * itemsize)

    tm = _SUBLANE
    for cand in (1024, 512, 256, 128, 64, 32, 16, 8):
        if grid_need(cand) <= _VMEM_BUDGET:
            tm = cand
            break
    # TODO(synk): if even tm=8 exceeds the budget (very wide layers), stream
    # weights layer-by-layer with a manual double-buffered make_async_copy
    # pipeline instead of keeping every W_i resident.

    # Keep >= 2 grid steps so megacore ("parallel") can shard the batch across
    # both TensorCores on v7x.
    tm = min(tm, max(_SUBLANE, _round_up(pl.cdiv(B8, 2), _SUBLANE)))
    grid = (pl.cdiv(B8, tm),)

    in_specs = [pl.BlockSpec((tm, K), lambda i: (i, 0))]
    for wp, bp in prepared_params:
        kp, np_ = wp.shape
        in_specs.append(pl.BlockSpec((kp, np_), lambda i: (0, 0)))
        in_specs.append(pl.BlockSpec((1, np_), lambda i: (0, 0)))

    bytes_accessed = (B8 * K + B8 * N_out) * itemsize + param_bytes
    out = pl.pallas_call(
        kernel,
        out_shape=jax.ShapeDtypeStruct((B8, N_out), x.dtype),
        grid=grid,
        in_specs=in_specs,
        out_specs=pl.BlockSpec((tm, N_out), lambda i: (i, 0)),
        compiler_params=pltpu.CompilerParams(
            dimension_semantics=("parallel",),
            vmem_limit_bytes=_vmem_limit(grid_need(tm))),
        cost_estimate=pl.CostEstimate(
            flops=flops, transcendentals=0, bytes_accessed=bytes_accessed),
    )(x_in, *flat)
    return out if B8 == B else out[:B]


def init_decoder_params(layer_sizes, key):
    """Deterministic init matching weights_init: xavier_uniform(gain=0.5), bias=0."""
    params = []
    for i in range(len(layer_sizes) - 1):
        fan_in, fan_out = layer_sizes[i], layer_sizes[i + 1]
        key, sub = jax.random.split(key)
        bound = 0.5 * math.sqrt(6.0 / (fan_in + fan_out))
        # stored as [in, out] (transpose of PyTorch's [out, in]; same distribution)
        w = jax.random.uniform(
            sub, (fan_in, fan_out), dtype=jnp.float32, minval=-bound, maxval=bound)
        b = jnp.zeros((fan_out,), dtype=jnp.float32)
        params.append((w, b))
    return params


def decoder_reference(x, params):
    out = x
    for w, b in params:
        out = jnp.maximum(
            jnp.dot(out, w, precision=jax.lax.Precision.HIGHEST) + b, 0.0)
    return out


if __name__ == "__main__":
    layer_sizes = [32, 64, 16]   # Decoder(layer_sizes)

    key = jax.random.PRNGKey(0)
    key, xkey, bigkey = jax.random.split(key, 3)
    params = init_decoder_params(layer_sizes, key)
    prepared = prepare_decoder_params(params)   # one-time padding, outside the step

    fwd = jax.jit(decoder_forward)

    # Small-batch path (single fused, un-gridded kernel; no pads, no slices).
    batch = 8
    x = jax.random.normal(xkey, (batch, layer_sizes[0]), dtype=jnp.float32)
    out = jax.block_until_ready(fwd(x, prepared))
    ref = decoder_reference(x, params)
    assert out.shape == (batch, layer_sizes[-1])
    assert jnp.allclose(out, ref, atol=1e-5, rtol=1e-5)

    # Large-batch path (batch-tiled "parallel" grid, weights resident).
    big = 384
    x_big = jax.random.normal(bigkey, (big, layer_sizes[0]), dtype=jnp.float32)
    out_big = jax.block_until_ready(fwd(x_big, prepared))
    ref_big = decoder_reference(x_big, params)
    assert out_big.shape == (big, layer_sizes[-1])
    assert jnp.allclose(out_big, ref_big, atol=1e-5, rtol=1e-5)

    print("KERNEL_OK")
</pallas_src>

<mosaic_0001>
module attributes {stable_mosaic.version = 11 : i64} {
  func.func @kernel(%arg0: memref<8x32xf32, #tpu.memory_space<vmem>>, %arg1: memref<32x128xf32, #tpu.memory_space<vmem>>, %arg2: memref<1x128xf32, #tpu.memory_space<vmem>>, %arg3: memref<128x16xf32, #tpu.memory_space<vmem>>, %arg4: memref<1x16xf32, #tpu.memory_space<vmem>>, %arg5: memref<8x16xf32, #tpu.memory_space<vmem>>) attributes {dimension_semantics = [], scalar_prefetch = 0 : i64, scratch_operands = 0 : i64, tpu.core_type = #tpu.core_type<tc>} {
    %c0 = arith.constant 0 : index
    %c0_0 = arith.constant 0 : index
    %0 = vector.load %arg0[%c0, %c0_0] : memref<8x32xf32, #tpu.memory_space<vmem>>, vector<8x32xf32>
    %c0_1 = arith.constant 0 : index
    %c0_2 = arith.constant 0 : index
    %1 = vector.load %arg1[%c0_1, %c0_2] : memref<32x128xf32, #tpu.memory_space<vmem>>, vector<32x128xf32>
    %c0_3 = arith.constant 0 : index
    %c0_4 = arith.constant 0 : index
    %2 = vector.load %arg2[%c0_3, %c0_4] : memref<1x128xf32, #tpu.memory_space<vmem>>, vector<1x128xf32>
    %cst = arith.constant dense<0.000000e+00> : vector<8x128xf32>
    %3 = tpu.matmul %0, %1, %cst {dimension_numbers = #tpu.dot_dimension_numbers<[1], [0], [0], [1], [0, 0, 1, 1], [], []>, precision = #tpu.contract_precision<fp32>} : vector<8x32xf32>, vector<32x128xf32>, vector<8x128xf32> -> vector<8x128xf32>
    %4 = vector.broadcast %2 : vector<1x128xf32> to vector<8x128xf32>
    %5 = arith.addf %3, %4 : vector<8x128xf32>
    %cst_5 = arith.constant 0.000000e+00 : f32
    %6 = vector.broadcast %cst_5 : f32 to vector<8x128xf32>
    %7 = arith.maximumf %5, %6 : vector<8x128xf32>
    %c0_6 = arith.constant 0 : index
    %c0_7 = arith.constant 0 : index
    %8 = vector.load %arg3[%c0_6, %c0_7] : memref<128x16xf32, #tpu.memory_space<vmem>>, vector<128x16xf32>
    %c0_8 = arith.constant 0 : index
    %c0_9 = arith.constant 0 : index
    %9 = vector.load %arg4[%c0_8, %c0_9] : memref<1x16xf32, #tpu.memory_space<vmem>>, vector<1x16xf32>
    %cst_10 = arith.constant dense<0.000000e+00> : vector<8x16xf32>
    %10 = tpu.matmul %7, %8, %cst_10 {dimension_numbers = #tpu.dot_dimension_numbers<[1], [0], [0], [1], [0, 0, 1, 1], [], []>, precision = #tpu.contract_precision<fp32>} : vector<8x128xf32>, vector<128x16xf32>, vector<8x16xf32> -> vector<8x16xf32>
    %11 = vector.broadcast %9 : vector<1x16xf32> to vector<8x16xf32>
    %12 = arith.addf %10, %11 : vector<8x16xf32>
    %cst_11 = arith.constant 0.000000e+00 : f32
    %13 = vector.broadcast %cst_11 : f32 to vector<8x16xf32>
    %14 = arith.maximumf %12, %13 : vector<8x16xf32>
    %c0_12 = arith.constant 0 : index
    %c0_13 = arith.constant 0 : index
    %15 = vector.load %arg5[%c0_12, %c0_13] : memref<8x16xf32, #tpu.memory_space<vmem>>, vector<8x16xf32>
    tpu.vector_store %arg5[%c0_12, %c0_13], %14 {strides = array<i32>} : memref<8x16xf32, #tpu.memory_space<vmem>>, vector<8x16xf32>,
    return
  }
}

</mosaic_0001>

<bundles_post_ra>
// kernel: decoder_forward.1
= control target key start
LH: loop header
LB: loop body
LE: loop exit
PB: predicated region body
PF: predicated region fallthrough
CT: control target
= control target key end

     0   :  { %vm33_vm0 = vcmask 261120   ;;  %v1639_v3 = vmov 0.0   ;;  %vm1640_vm1 = vmmov 0   ;;  %s2184_s0 = inlined_call_operand.vmem [shape: f32[8,32], index: 0, kind: input, shape index: {}]   ;;  %s2185_s1 = inlined_call_operand.vmem [shape: f32[32,128], index: 1, kind: input, shape index: {}]   ;;  %s2186_s2 = inlined_call_operand.vmem [shape: f32[1,128], index: 2, kind: input, shape index: {}]   ;;  %s2187_s3 = inlined_call_operand.vmem [shape: f32[128,16], index: 3, kind: input, shape index: {}]   ;;  %s2188_s4 = inlined_call_operand.vmem [shape: f32[1,16], index: 4, kind: input, shape index: {}]   ;;  %s2189_s5 = inlined_call_operand.hbm [shape: f32[8,16], index: 5, kind: output, shape index: {}]  }
   0x1   :  { %v25_v0 = vld [vmem:[%s2185_s1 + $0x18] sm:$0xff]  ;;  %v24_v1 = vld [vmem:[%s2185_s1 + $0x10] sm:$0xff]  ;;  %v23_v2 = vld [vmem:[%s2185_s1 + $0x8] sm:$0xff]  ;;  %1338 = vmatprep.subr.mxu0 %v1639_v3  ;;  %1349 = vmatprep.subr.mxu1 %v1639_v3 }
   0x2   :  { %v1682_v4 = vand.u32 4294901760, %v25_v0  ;;  %v1684_v5 = vand.u32 4294901760, %v24_v1  ;;  %v1686_v6 = vand.u32 4294901760, %v23_v2  ;;  %v22_v7 = vld [vmem:[%s2185_s1] sm:$0xff]  ;;  %1346 = vmatprep.mubr.msk.f32.mxu0 %vm1640_vm1, %v1639_v3  ;;  %1357 = vmatprep.mubr.msk.f32.mxu1 %vm1640_vm1, %v1639_v3 }
   0x3   :  { %v21_v8 = vld [vmem:[%s2184_s0] sm:$0xff]  ;;  %v1695_v9 = vand.u32 4294901760, %v22_v7 }
   0x4   :  { %v35_v10 = vsel %vm33_vm0, %v21_v8, 0  ;;  %1339 = vmatpush3.msra.mxu0 %v1682_v4  ;;  %v142_v11 = vsub.f32 %v25_v0, %v1682_v4  ;;  %v149_v13 = vsub.f32 %v24_v1, %v1684_v5  ;;  %v1707_v14 = vsub.f32 %v23_v2, %v1686_v6 }
   0x5   :  { %v1703_v12 = vand.u32 4294901760, %v35_v10 }
   0x6   :  { %10 = vsyncpa [#allocation3], 0  ;;  %1340 = vmatprep.subr.mxu0 %v1639_v3  ;;  %v1711_v15 = vsub.f32 %v22_v7, %v1695_v9  ;;  %v143_v16 = vand.u32 4294901760, %v142_v11  ;;  %v150_v18 = vand.u32 4294901760, %v149_v13  ;;  %v157_v19 = vand.u32 4294901760, %v1707_v14  ;;  %v538_v32 = vld [vmem:[%s2187_s3 + $0x78] sm:$0xff] }
   0x7   :  { %1341 = vmatpush3.msra.mxu0 %v1684_v5  ;;  %v1715_v17 = vsub.f32 %v35_v10, %v1703_v12  ;;  %v537_v33 = vld [vmem:[%s2187_s3 + $0x70] sm:$0xff]  ;;  %v1743_v34 = vand.u32 4294901760, %v538_v32  ;;  %v536_v35 = vld [vmem:[%s2187_s3 + $0x68] sm:$0xff]  ;;  %v535_v50 = vld [vmem:[%s2187_s3 + $0x60] sm:$0xff]  ;;  %s1641_s8 = smov [#allocation2]   ;;  %vm1188_vm2 = vcmask 130048  }
   0x8   :  { %1342 = vmatprep.subr.mxu0 %v1639_v3  ;;  %v164_v20 = vand.u32 4294901760, %v1711_v15  ;;  %v144_v21 = vsub.f32 %v142_v11, %v143_v16  ;;  %v151_v23 = vsub.f32 %v149_v13, %v150_v18  ;;  %v158_v24 = vsub.f32 %v1707_v14, %v157_v19  ;;  %v534_v52 = vld [vmem:[%s2187_s3 + $0x58] sm:$0xff]  ;;  %v533_v55 = vld [vmem:[%s2187_s3 + $0x50] sm:$0xff]  ;;  %v532_v59 = vld [vmem:[%s2187_s3 + $0x48] sm:$0xff]  ;;  %s1196_s9 = sshll.u32 %s1641_s8, 4  ;;  %s1197_s9 = int_to_ptr.vmem [resolvable:$true] %s1196_s9 }
   0x9   :  { %1343 = vmatpush3.msra.mxu0 %v1686_v6  ;;  %v108_v22 = vand.u32 4294901760, %v1715_v17  ;;  %v1753_v36 = vand.u32 4294901760, %v537_v33  ;;  %v1759_v37 = vsub.f32 %v538_v32, %v1743_v34  ;;  %v1761_v38 = vand.u32 4294901760, %v536_v35  ;;  %v531_v0 = vld [vmem:[%s2187_s3 + $0x40] sm:$0xff]  ;;  %v530_v7 = vld [vmem:[%s2187_s3 + $0x38] sm:$0xff]  ;;  %s1617_s10 = scalar_lea.vmem %s1197_s9, 128  ;;  %p1622_p1 = scmp.lt.s32.totalorder %s1197_s9, %s1197_s9 }
   0xa   :  { %1344 = vmatprep.subr.mxu0 %v1639_v3  ;;  %v145_v25 = vand.u32 4294901760, %v144_v21  ;;  %v152_v27 = vand.u32 4294901760, %v151_v23  ;;  %v165_v28 = vsub.f32 %v1711_v15, %v164_v20  ;;  %v159_v30 = vand.u32 4294901760, %v158_v24  ;;  %p1618_p0 = scmp.ne.s32.totalorder %s1197_s9, %s1617_s10  ;;  %p1623_p2 = scmp.lt.s32.totalorder %s1617_s10, %s1617_s10 }
   0xb   :  { %1345 = vmatpush3.msra.mxu0 %v1695_v9  ;;  %v109_v26 = vsub.f32 %v1715_v17, %v108_v22  ;;  %v1767_v39 = vsub.f32 %v537_v33, %v1753_v36  ;;  %v640_v40 = vand.u32 4294901760, %v1759_v37  ;;  %v1776_v41 = vsub.f32 %v536_v35, %v1761_v38 }
   0xc   :  { %1360 = vmatprep.subr.mxu0 %v1639_v3  ;;  %1350 = vmatpush3.msra.mxu1 %v145_v25  ;;  %v166_v31 = vand.u32 4294901760, %v165_v28  ;;  %v1822_v51 = vand.u32 4294901760, %v535_v50  ;;  %v1830_v54 = vand.u32 4294901760, %v534_v52  ;;  %v1841_v58 = vand.u32 4294901760, %v533_v55  ;;  %v527_v25 = vld [vmem:[%s2187_s3 + $0x20] sm:$0xff]  ;;  %p1624_p3 = por %p1623_p2, %p1622_p1 }
   0xd   :  { %v110_v29 = vand.u32 4294901760, %v109_v26  ;;  %1351 = vmatprep.subr.mxu1 %v1639_v3  ;;  %v647_v42 = vand.u32 4294901760, %v1767_v39  ;;  %v641_v43 = vsub.f32 %v1759_v37, %v640_v40  ;;  %v654_v44 = vand.u32 4294901760, %v1776_v41 }
   0xe   :  { %1352 = vmatpush3.msra.mxu1 %v152_v27  ;;  %v1828_v53 = vsub.f32 %v535_v50, %v1822_v51  ;;  %v1839_v57 = vsub.f32 %v534_v52, %v1830_v54  ;;  %v1853_v62 = vsub.f32 %v533_v55, %v1841_v58  ;;  %v1855_v63 = vand.u32 4294901760, %v532_v59  ;;  %v524_v55 = vld [vmem:[%s2187_s3 + $0x8] sm:$0xff]  ;;  %p1625_p4 = pnand %p1624_p3, %p1618_p0 }
   0xf   :  { %1347 = vmatmul.mubr.f32.vlgmr.msra.gmra.mxu0 %v110_v29  ;;  %1353 = vmatprep.subr.mxu1 %v1639_v3  ;;  %v648_v45 = vsub.f32 %v1767_v39, %v647_v42  ;;  %v642_v46 = vand.u32 4294901760, %v641_v43  ;;  %v655_v47 = vsub.f32 %v1776_v41, %v654_v44  ;;  %v1927_v29 = vand.u32 4294901760, %v527_v25 }
  0x10   :  { %1361 = vmatpush3.msra.mxu0 %v142_v11  ;;  %1354 = vmatpush3.msra.mxu1 %v159_v30  ;;  %v661_v56 = vand.u32 4294901760, %v1828_v53  ;;  %v668_v61 = vand.u32 4294901760, %v1839_v57  ;;  %v1880_v11 = vand.u32 4294901760, %v530_v7 }
  0x11   :  { %1362 = vmatprep.subr.mxu0 %v1639_v3  ;;  %1355 = vmatprep.subr.mxu1 %v1639_v3  ;;  %v649_v48 = vand.u32 4294901760, %v648_v45  ;;  %v656_v49 = vand.u32 4294901760, %v655_v47  ;;  %v1940_v43 = vsub.f32 %v527_v25, %v1927_v29 }
  0x12   :  { %1363 = vmatpush3.msra.mxu0 %v149_v13  ;;  %1356 = vmatpush3.msra.mxu1 %v166_v31  ;;  %v662_v60 = vsub.f32 %v1828_v53, %v661_v56  ;;  %v669_v2 = vsub.f32 %v1839_v57, %v668_v61  ;;  %v529_v13 = vld [vmem:[%s2187_s3 + $0x30] sm:$0xff]  ;;  %v526_v31 = vld [vmem:[%s2187_s3 + $0x18] sm:$0xff] }
  0x13   :  { %1364 = vmatprep.subr.mxu0 %v1639_v3  ;;  %1358 = vmatmul.mubr.f32.vlgmr.msra.gmra.mxu1 %v1703_v12  ;;  %v1943_v45 = vand.u32 4294901760, %v526_v31 }
  0x14   :  { %1365 = vmatpush3.msra.mxu0 %v1707_v14  ;;  %1371 = vmatprep.subr.mxu1 %v1639_v3  ;;  %v663_v1 = vand.u32 4294901760, %v662_v60  ;;  %v670_v8 = vand.u32 4294901760, %v669_v2 }
  0x15   :  { %1366 = vmatprep.subr.mxu0 %v1639_v3  ;;  %1372 = vmatpush3.msra.mxu1 %v1682_v4  ;;  %v1958_v52 = vsub.f32 %v526_v31, %v1943_v45 }
  0x16   :  { %1367 = vmatpush3.msra.mxu0 %v1711_v15  ;;  %1368 = vmatprep.mubr.msk.f32.mxu0 %vm1640_vm1, %v1639_v3 }
  0x17   :  { %1373 = vmatprep.subr.mxu1 %v1639_v3  ;;  %1382 = vmatprep.subr.mxu0 %v1639_v3  ;;  %v2193_v2 = vand.u32 4294901760, %v1958_v52 }
  0x18   :  { %1369 = vmatmul.mubr.f32.vlgmr.msra.gmra.mxu0 %v1715_v17  ;;  %1374 = vmatpush3.msra.mxu1 %v1684_v5  ;;  %v1896_v17 = vand.u32 4294901760, %v529_v13 }
  0x19   :  { %1383 = vmatpush3.msra.mxu0 %v143_v16  ;;  %1375 = vmatprep.subr.mxu1 %v1639_v3  ;;  %v1894_v16 = vsub.f32 %v530_v7, %v1880_v11  ;;  %v523_v7 = vld [vmem:[%s2187_s3] sm:$0xff] }
  0x1a   :  { %1384 = vmatprep.subr.mxu0 %v1639_v3  ;;  %1376 = vmatpush3.msra.mxu1 %v1686_v6 }
  0x1b   :  { %1385 = vmatpush3.msra.mxu0 %v150_v18  ;;  %1377 = vmatprep.subr.mxu1 %v1639_v3  ;;  %v696_v21 = vand.u32 4294901760, %v1894_v16 }
  0x1c   :  { %1386 = vmatprep.subr.mxu0 %v1639_v3  ;;  %1378 = vmatpush3.msra.mxu1 %v1695_v9 }
  0x1d   :  { %1379 = vmatprep.mubr.msk.f32.mxu1 %vm1640_vm1, %v1639_v3  ;;  %1387 = vmatpush3.msra.mxu0 %v157_v19  ;;  %v528_v19 = vld [vmem:[%s2187_s3 + $0x28] sm:$0xff]  ;;  %v697_v26 = vsub.f32 %v1894_v16, %v696_v21 }
  0x1e   :  { %1380 = vmatmul.mubr.f32.vlgmr.msra.gmra.mxu1 %v108_v22  ;;  %1388 = vmatprep.subr.mxu0 %v1639_v3  ;;  %v1907_v22 = vsub.f32 %v529_v13, %v1896_v17  ;;  %v1909_v23 = vand.u32 4294901760, %v528_v19 }
  0x1f   :  { %1393 = vmatprep.subr.mxu1 %v1639_v3  ;;  %1389 = vmatpush3.msra.mxu0 %v164_v20  ;;  %v698_v32 = vand.u32 4294901760, %v697_v26 }
  0x20   :  { %1390 = vmatprep.mubr.msk.f32.mxu0 %vm1640_vm1, %v1639_v3  ;;  %1394 = vmatpush3.msra.mxu1 %v1682_v4  ;;  %v675_v4 = vand.u32 4294901760, %v1853_v62  ;;  %v703_v27 = vand.u32 4294901760, %v1907_v22  ;;  %v1925_v28 = vsub.f32 %v528_v19, %v1909_v23 }
  0x21   :  { %1391 = vmatmul.mubr.f32.vlgmr.msra.gmra.mxu0 %v1703_v12  ;;  %1395 = vmatprep.subr.mxu1 %v1639_v3 }
  0x22   :  { %1401 = vmatprep.mubr.msk.f32.mxu1 %vm1640_vm1, %v1639_v3  ;;  %1396 = vmatpush3.msra.mxu1 %v1684_v5  ;;  %v1867_v5 = vsub.f32 %v532_v59, %v1855_v63  ;;  %v704_v33 = vsub.f32 %v1907_v22, %v703_v27  ;;  %v2195_v35 = vand.u32 4294901760, %v1925_v28 }
  0x23   :  { %1404 = vmatprep.subr.mxu0 %v1639_v3  ;;  %1397 = vmatprep.subr.mxu1 %v1639_v3 }
  0x24   :  { %1405 = vmatpush3.msra.mxu0 %v1743_v34  ;;  %1398 = vmatpush3.msra.mxu1 %v1686_v6  ;;  %v1870_v6 = vand.u32 4294901760, %v531_v0  ;;  %v682_v10 = vand.u32 4294901760, %v1867_v5  ;;  %v705_v47 = vand.u32 4294901760, %v704_v33 }
  0x25   :  { %1406 = vmatprep.subr.mxu0 %v1639_v3  ;;  %1399 = vmatprep.subr.mxu1 %v1639_v3 }
  0x26   :  { %1407 = vmatpush3.msra.mxu0 %v1753_v36  ;;  %1400 = vmatpush3.msra.mxu1 %v1695_v9  ;;  %v676_v9 = vsub.f32 %v1853_v62, %v675_v4  ;;  %v683_v15 = vsub.f32 %v1867_v5, %v682_v10 }
  0x27   :  { %1408 = vmatprep.subr.mxu0 %v1639_v3  ;;  %1402 = vmatmul.mubr.f32.vlgmr.msra.gmra.mxu1 %v1703_v12  ;;  %v1884_v12 = vsub.f32 %v531_v0, %v1870_v6 }
  0x28   :  { %1439 = vmatprep.subr.mxu1 %v1639_v3  ;;  %1409 = vmatpush3.msra.mxu0 %v1761_v38  ;;  %v677_v14 = vand.u32 4294901760, %v676_v9  ;;  %v684_v20 = vand.u32 4294901760, %v683_v15  ;;  %v725_v15 = vsub.f32 %v1958_v52, %v2193_v2 }
  0x29   :  { %1440 = vmatpush3.msra.mxu1 %v642_v46  ;;  %1410 = vmatprep.subr.mxu0 %v1639_v3  ;;  %v689_v18 = vand.u32 4294901760, %v1884_v12  ;;  %v525_v46 = vld [vmem:[%s2187_s3 + $0x10] sm:$0xff] }
  0x2a   :  { %1441 = vmatprep.subr.mxu1 %v1639_v3  ;;  %1471 = vmatprep.mubr.msk.f32.mxu1 %vm1640_vm1, %v1639_v3  ;;  %v1954_v50 = vand.u32 4294901760, %v525_v46  ;;  %v726_v25 = vand.u32 4294901760, %v725_v15 }
  0x2b   :  { %1442 = vmatpush3.msra.mxu1 %v649_v48  ;;  %1436 = vmatprep.mubr.msk.f32.mxu0 %vm1640_vm1, %v1639_v3  ;;  %v690_v24 = vsub.f32 %v1884_v12, %v689_v18  ;;  %v711_v48 = vsub.f32 %v1925_v28, %v2195_v35 }
  0x2c   :  { %1443 = vmatprep.subr.mxu1 %v1639_v3  ;;  %1411 = vmatpush3.msra.mxu0 %v1822_v51  ;;  %v1969_v0 = vsub.f32 %v525_v46, %v1954_v50 }
  0x2d   :  { %1444 = vmatpush3.msra.mxu1 %v656_v49  ;;  %1412 = vmatprep.subr.mxu0 %v1639_v3  ;;  %v691_v30 = vand.u32 4294901760, %v690_v24  ;;  %v2194_v49 = vand.u32 4294901760, %v1940_v43  ;;  %v712_v59 = vand.u32 4294901760, %v711_v48 }
  0x2e   :  { %1445 = vmatprep.subr.mxu1 %v1639_v3  ;;  %1413 = vmatpush3.msra.mxu0 %v1830_v54  ;;  %v2192_v9 = vand.u32 4294901760, %v1969_v0 }
  0x2f   :  { %1414 = vmatprep.subr.mxu0 %v1639_v3  ;;  %1446 = vmatpush3.msra.mxu1 %v663_v1  ;;  %v718_v60 = vsub.f32 %v1940_v43, %v2194_v49  ;;  %v1971_v1 = vand.u32 4294901760, %v524_v55 }
  0x30   :  { %1415 = vmatpush3.msra.mxu0 %v1841_v58  ;;  %1447 = vmatprep.subr.mxu1 %v1639_v3  ;;  %v732_v19 = vsub.f32 %v1969_v0, %v2192_v9 }
  0x31   :  { %1416 = vmatprep.subr.mxu0 %v1639_v3  ;;  %1448 = vmatpush3.msra.mxu1 %v670_v8  ;;  %v719_v8 = vand.u32 4294901760, %v718_v60  ;;  %v1982_v13 = vsub.f32 %v524_v55, %v1971_v1 }
  0x32   :  { %1417 = vmatpush3.msra.mxu0 %v1855_v63  ;;  %1449 = vmatprep.subr.mxu1 %v1639_v3  ;;  %v733_v26 = vand.u32 4294901760, %v732_v19 }
  0x33   :  { %1418 = vmatprep.subr.mxu0 %v1639_v3  ;;  %1450 = vmatpush3.msra.mxu1 %v677_v14  ;;  %v1984_v14 = vand.u32 4294901760, %v523_v7 }
  0x34   :  { %1419 = vmatpush3.msra.mxu0 %v1870_v6  ;;  %1451 = vmatprep.subr.mxu1 %v1639_v3 }
  0x35   :  { %1420 = vmatprep.subr.mxu0 %v1639_v3  ;;  %1452 = vmatpush3.msra.mxu1 %v684_v20  ;;  %v2191_v20 = vand.u32 4294901760, %v1982_v13  ;;  %v1997_v24 = vsub.f32 %v523_v7, %v1984_v14 }
  0x36   :  { %1421 = vmatpush3.msra.mxu0 %v1880_v11  ;;  %1453 = vmatprep.subr.mxu1 %v1639_v3 }
  0x37   :  { %1422 = vmatprep.subr.mxu0 %v1639_v3  ;;  %1454 = vmatpush3.msra.mxu1 %v691_v30  ;;  %v739_v30 = vsub.f32 %v1982_v13, %v2191_v20  ;;  %v2190_v31 = vand.u32 4294901760, %v1997_v24 }
  0x38   :  { %1423 = vmatpush3.msra.mxu0 %v1896_v17  ;;  %1455 = vmatprep.subr.mxu1 %v1639_v3 }
  0x39   :  { %1424 = vmatprep.subr.mxu0 %v1639_v3  ;;  %1456 = vmatpush3.msra.mxu1 %v698_v32  ;;  %v740_v32 = vand.u32 4294901760, %v739_v30  ;;  %v746_v33 = vsub.f32 %v1997_v24, %v2190_v31 }
  0x3a   :  { %1425 = vmatpush3.msra.mxu0 %v1909_v23  ;;  %1457 = vmatprep.subr.mxu1 %v1639_v3 }
  0x3b   :  { %1426 = vmatprep.subr.mxu0 %v1639_v3  ;;  %1458 = vmatpush3.msra.mxu1 %v705_v47  ;;  %v747_v46 = vand.u32 4294901760, %v746_v33 }
  0x3c   :  { %1427 = vmatpush3.msra.mxu0 %v1927_v29  ;;  %1459 = vmatprep.subr.mxu1 %v1639_v3 }
  0x3d   :  { %1428 = vmatprep.subr.mxu0 %v1639_v3  ;;  %1460 = vmatpush3.msra.mxu1 %v712_v59  ;;  %v1204_v59 = vld [vmem:[%s2186_s2] ss:$0 sm:$0xff] }
  0x3e   :  { %1429 = vmatpush3.msra.mxu0 %v1943_v45  ;;  %1461 = vmatprep.subr.mxu1 %v1639_v3 }
  0x3f   :  { %1430 = vmatprep.subr.mxu0 %v1639_v3  ;;  %1462 = vmatpush3.msra.mxu1 %v719_v8 }
  0x40   :  { %1431 = vmatpush3.msra.mxu0 %v1954_v50  ;;  %1463 = vmatprep.subr.mxu1 %v1639_v3 }
  0x41   :  { %1432 = vmatprep.subr.mxu0 %v1639_v3  ;;  %1464 = vmatpush3.msra.mxu1 %v726_v25 }
  0x42   :  { %1433 = vmatpush3.msra.mxu0 %v1971_v1  ;;  %1465 = vmatprep.subr.mxu1 %v1639_v3 }
  0x43   :  { %1434 = vmatprep.subr.mxu0 %v1639_v3  ;;  %1466 = vmatpush3.msra.mxu1 %v733_v26 }
  0x44   :  { %1435 = vmatpush3.msra.mxu0 %v1984_v14  ;;  %1467 = vmatprep.subr.mxu1 %v1639_v3 }
  0x45   :  { %1474 = vmatprep.subr.mxu0 %v1639_v3  ;;  %1468 = vmatpush3.msra.mxu1 %v740_v32 }
  0x46   :  { %1469 = vmatprep.subr.mxu1 %v1639_v3 }
  0x47   :  { %1470 = vmatpush3.msra.mxu1 %v747_v46 }
  0x48   :  { %1509 = vmatprep.subr.mxu1 %v1639_v3 }
  0xcf   :  { %v112_v47 = vpop.f32.mrf.mxu0 }
  0xd0   :  { %v113_v8 = vadd.f32 %v1204_v59, %v112_v47 }
  0xd1   :  { %v1348_v48 = vpop.f32.mrf.mxu0 }
  0xd3   :  { %v203_v55 = vpop.f32.mrf.mxu1 }
  0xd4   :  { %v204_v19 = vadd.f32 %v203_v55, %v113_v8 }
  0xd5   :  { %v1359_v60 = vpop.f32.mrf.mxu1 }
  0xd8   :  { %v283_v7 = vpop.f32.mrf.mxu0 }
  0xd9   :  { %v284_v30 = vadd.f32 %v283_v7, %v204_v19 }
  0xda   :  { %v1370_v15 = vpop.f32.mrf.mxu0 }
  0xde   :  { %v360_v25 = vpop.f32.mrf.mxu1 }
  0xdf   :  { %v361_v33 = vadd.f32 %v360_v25, %v284_v30 }
  0xe0   :  { %v1381_v26 = vpop.f32.mrf.mxu1 }
  0xe1   :  { %v443_v32 = vpop.f32.mrf.mxu0 }
  0xe2   :  { %v444_v31 = vadd.f32 %v443_v32, %v361_v33 }
  0xe3   :  { %v1392_v46 = vpop.f32.mrf.mxu0 }
  0xe7   :  { %v518_v20 = vpop.f32.mrf.mxu1 }
  0xe8   :  { %v519_v9 = vadd.f32 %v518_v20, %v444_v31 }
  0xe9   :  { %v1403_v48 = vpop.f32.mrf.mxu1 }
  0xea   :  { %v522_v2 = vmax.f32 %v519_v9, 0.0 }
  0xec   :  { %v2017_v49 = vand.u32 4294901760, %v522_v2 }
  0xee   :  { %v2020_v35 = vsub.f32 %v522_v2, %v2017_v49  ;;  %1472 = vmatmul.mubr.f32.vlgmr.msra.gmra.mxu1 %v2017_v49 }
  0xef   :  { %1510 = vmatpush3.msra.mxu1 %v1743_v34  ;;  %1541 = vmatprep.mubr.msk.f32.mxu1 %vm1640_vm1, %v1639_v3 }
  0xf0   :  { %v629_v47 = vand.u32 4294901760, %v2020_v35  ;;  %1511 = vmatprep.subr.mxu1 %v1639_v3 }
  0xf1   :  { %1512 = vmatpush3.msra.mxu1 %v1753_v36 }
  0xf2   :  { %v630_v9 = vsub.f32 %v2020_v35, %v629_v47  ;;  %1513 = vmatprep.subr.mxu1 %v1639_v3 }
  0xf3   :  { %1514 = vmatpush3.msra.mxu1 %v1761_v38 }
  0xf4   :  { %1515 = vmatprep.subr.mxu1 %v1639_v3  ;;  %v631_v2 = vand.u32 4294901760, %v630_v9 }
  0xf5   :  { %1516 = vmatpush3.msra.mxu1 %v1822_v51 }
  0xf6   :  { %1517 = vmatprep.subr.mxu1 %v1639_v3  ;;  %1437 = vmatmul.mubr.f32.vlgmr.msra.gmra.mxu0 %v631_v2 }
  0xf7   :  { %1475 = vmatpush3.msra.mxu0 %v1759_v37  ;;  %1518 = vmatpush3.msra.mxu1 %v1830_v54  ;;  %v2198_v37 = vand.u32 4294901760, %v1958_v52 }
  0xf8   :  { %1476 = vmatprep.subr.mxu0 %v1639_v3  ;;  %1519 = vmatprep.subr.mxu1 %v1639_v3 }
  0xf9   :  { %1477 = vmatpush3.msra.mxu0 %v1767_v39  ;;  %1520 = vmatpush3.msra.mxu1 %v1841_v58  ;;  %v2200_v39 = vand.u32 4294901760, %v1982_v13 }
  0xfa   :  { %1478 = vmatprep.subr.mxu0 %v1639_v3  ;;  %1521 = vmatprep.subr.mxu1 %v1639_v3 }
  0xfb   :  { %1479 = vmatpush3.msra.mxu0 %v1776_v41  ;;  %1522 = vmatpush3.msra.mxu1 %v1855_v63 }
  0xfc   :  { %1480 = vmatprep.subr.mxu0 %v1639_v3  ;;  %1523 = vmatprep.subr.mxu1 %v1639_v3 }
  0xfd   :  { %1481 = vmatpush3.msra.mxu0 %v1828_v53  ;;  %1524 = vmatpush3.msra.mxu1 %v1870_v6 }
  0xfe   :  { %1482 = vmatprep.subr.mxu0 %v1639_v3  ;;  %1525 = vmatprep.subr.mxu1 %v1639_v3 }
  0xff   :  { %1483 = vmatpush3.msra.mxu0 %v1839_v57  ;;  %1526 = vmatpush3.msra.mxu1 %v1880_v11 }
 0x100   :  { %1484 = vmatprep.subr.mxu0 %v1639_v3  ;;  %1527 = vmatprep.subr.mxu1 %v1639_v3 }
 0x101   :  { %1485 = vmatpush3.msra.mxu0 %v1853_v62  ;;  %1528 = vmatpush3.msra.mxu1 %v1896_v17 }
 0x102   :  { %1486 = vmatprep.subr.mxu0 %v1639_v3  ;;  %1529 = vmatprep.subr.mxu1 %v1639_v3 }
 0x103   :  { %1487 = vmatpush3.msra.mxu0 %v1867_v5  ;;  %1530 = vmatpush3.msra.mxu1 %v1909_v23 }
 0x104   :  { %1488 = vmatprep.subr.mxu0 %v1639_v3  ;;  %1531 = vmatprep.subr.mxu1 %v1639_v3 }
 0x105   :  { %1489 = vmatpush3.msra.mxu0 %v1884_v12  ;;  %1532 = vmatpush3.msra.mxu1 %v1927_v29 }
 0x106   :  { %1490 = vmatprep.subr.mxu0 %v1639_v3  ;;  %1533 = vmatprep.subr.mxu1 %v1639_v3 }
 0x107   :  { %1491 = vmatpush3.msra.mxu0 %v1894_v16  ;;  %1534 = vmatpush3.msra.mxu1 %v1943_v45 }
 0x108   :  { %1492 = vmatprep.subr.mxu0 %v1639_v3  ;;  %1535 = vmatprep.subr.mxu1 %v1639_v3 }
 0x109   :  { %1493 = vmatpush3.msra.mxu0 %v1907_v22  ;;  %1536 = vmatpush3.msra.mxu1 %v1954_v50 }
 0x10a   :  { %1494 = vmatprep.subr.mxu0 %v1639_v3  ;;  %1537 = vmatprep.subr.mxu1 %v1639_v3 }
 0x10b   :  { %1495 = vmatpush3.msra.mxu0 %v1925_v28  ;;  %1538 = vmatpush3.msra.mxu1 %v1971_v1 }
 0x10c   :  { %1496 = vmatprep.subr.mxu0 %v1639_v3  ;;  %1539 = vmatprep.subr.mxu1 %v1639_v3 }
 0x10d   :  { %1497 = vmatpush3.msra.mxu0 %v1940_v43  ;;  %1540 = vmatpush3.msra.mxu1 %v1984_v14 }
 0x10e   :  { %1498 = vmatprep.subr.mxu0 %v1639_v3  ;;  %1542 = vmatmul.mubr.f32.vlgmr.msra.gmra.mxu1 %v629_v47 }
 0x10f   :  { %1579 = vmatprep.subr.mxu1 %v1639_v3  ;;  %1499 = vmatpush3.msra.mxu0 %v1958_v52 }
 0x110   :  { %1580 = vmatpush3.msra.mxu1 %v1743_v34  ;;  %1500 = vmatprep.subr.mxu0 %v1639_v3  ;;  %v2196_v34 = vand.u32 4294901760, %v1925_v28 }
 0x111   :  { %1581 = vmatprep.subr.mxu1 %v1639_v3  ;;  %1501 = vmatpush3.msra.mxu0 %v1969_v0 }
 0x112   :  { %1582 = vmatpush3.msra.mxu1 %v1753_v36  ;;  %1502 = vmatprep.subr.mxu0 %v1639_v3  ;;  %v2197_v36 = vand.u32 4294901760, %v1940_v43 }
 0x113   :  { %1583 = vmatprep.subr.mxu1 %v1639_v3  ;;  %1503 = vmatpush3.msra.mxu0 %v1982_v13 }
 0x114   :  { %1584 = vmatpush3.msra.mxu1 %v1761_v38  ;;  %1504 = vmatprep.subr.mxu0 %v1639_v3  ;;  %v2199_v38 = vand.u32 4294901760, %v1969_v0 }
 0x115   :  { %1585 = vmatprep.subr.mxu1 %v1639_v3  ;;  %1505 = vmatpush3.msra.mxu0 %v1997_v24 }
 0x116   :  { %1506 = vmatprep.mubr.msk.f32.mxu0 %vm1640_vm1, %v1639_v3  ;;  %1586 = vmatpush3.msra.mxu1 %v1822_v51 }
 0x117   :  { %1507 = vmatmul.mubr.f32.vlgmr.msra.gmra.mxu0 %v2020_v35  ;;  %1544 = vmatprep.subr.mxu0 %v1639_v3 }
 0x118   :  { %1587 = vmatprep.subr.mxu1 %v1639_v3  ;;  %1545 = vmatpush3.msra.mxu0 %v640_v40  ;;  %v2201_v40 = vand.u32 4294901760, %v1997_v24 }
 0x119   :  { %1588 = vmatpush3.msra.mxu1 %v1830_v54  ;;  %1546 = vmatprep.subr.mxu0 %v1639_v3 }
 0x11a   :  { %1589 = vmatprep.subr.mxu1 %v1639_v3  ;;  %1547 = vmatpush3.msra.mxu0 %v647_v42 }
 0x11b   :  { %1590 = vmatpush3.msra.mxu1 %v1841_v58  ;;  %1548 = vmatprep.subr.mxu0 %v1639_v3  ;;  %v1205_v58 = vld [vmem:[%s2188_s4] ss:$0 sm:$0xff] }
 0x11c   :  { %1591 = vmatprep.subr.mxu1 %v1639_v3  ;;  %1549 = vmatpush3.msra.mxu0 %v654_v44 }
 0x11d   :  { %1592 = vmatpush3.msra.mxu1 %v1855_v63  ;;  %1550 = vmatprep.subr.mxu0 %v1639_v3 }
 0x11e   :  { %1593 = vmatprep.subr.mxu1 %v1639_v3  ;;  %1551 = vmatpush3.msra.mxu0 %v661_v56 }
 0x11f   :  { %1594 = vmatpush3.msra.mxu1 %v1870_v6  ;;  %1552 = vmatprep.subr.mxu0 %v1639_v3 }
 0x120   :  { %1595 = vmatprep.subr.mxu1 %v1639_v3  ;;  %1553 = vmatpush3.msra.mxu0 %v668_v61 }
 0x121   :  { %1596 = vmatpush3.msra.mxu1 %v1880_v11  ;;  %1554 = vmatprep.subr.mxu0 %v1639_v3 }
 0x122   :  { %1597 = vmatprep.subr.mxu1 %v1639_v3  ;;  %1555 = vmatpush3.msra.mxu0 %v675_v4 }
 0x123   :  { %1598 = vmatpush3.msra.mxu1 %v1896_v17  ;;  %1556 = vmatprep.subr.mxu0 %v1639_v3 }
 0x124   :  { %1599 = vmatprep.subr.mxu1 %v1639_v3  ;;  %1557 = vmatpush3.msra.mxu0 %v682_v10 }
 0x125   :  { %1600 = vmatpush3.msra.mxu1 %v1909_v23  ;;  %1558 = vmatprep.subr.mxu0 %v1639_v3 }
 0x126   :  { %1601 = vmatprep.subr.mxu1 %v1639_v3  ;;  %1559 = vmatpush3.msra.mxu0 %v689_v18 }
 0x127   :  { %1602 = vmatpush3.msra.mxu1 %v1927_v29  ;;  %1560 = vmatprep.subr.mxu0 %v1639_v3 }
 0x128   :  { %1603 = vmatprep.subr.mxu1 %v1639_v3  ;;  %1561 = vmatpush3.msra.mxu0 %v696_v21 }
 0x129   :  { %1604 = vmatpush3.msra.mxu1 %v1943_v45  ;;  %1562 = vmatprep.subr.mxu0 %v1639_v3 }
 0x12a   :  { %1605 = vmatprep.subr.mxu1 %v1639_v3  ;;  %1563 = vmatpush3.msra.mxu0 %v703_v27 }
 0x12b   :  { %1606 = vmatpush3.msra.mxu1 %v1954_v50  ;;  %1564 = vmatprep.subr.mxu0 %v1639_v3 }
 0x12c   :  { %1607 = vmatprep.subr.mxu1 %v1639_v3  ;;  %1565 = vmatpush3.msra.mxu0 %v2196_v34 }
 0x12d   :  { %1608 = vmatpush3.msra.mxu1 %v1971_v1  ;;  %1566 = vmatprep.subr.mxu0 %v1639_v3 }
 0x12e   :  { %1609 = vmatprep.subr.mxu1 %v1639_v3  ;;  %1567 = vmatpush3.msra.mxu0 %v2197_v36 }
 0x12f   :  { %1610 = vmatpush3.msra.mxu1 %v1984_v14  ;;  %1611 = vmatprep.mubr.msk.f32.mxu1 %vm1640_vm1, %v1639_v3 }
 0x130   :  { %1568 = vmatprep.subr.mxu0 %v1639_v3  ;;  %1612 = vmatmul.mubr.f32.vlgmr.msra.gmra.mxu1 %v2017_v49 }
 0x131   :  { %1569 = vmatpush3.msra.mxu0 %v2198_v37  ;;  %1576 = vmatprep.mubr.msk.f32.mxu0 %vm1640_vm1, %v1639_v3 }
 0x132   :  { %1570 = vmatprep.subr.mxu0 %v1639_v3 }
 0x133   :  { %1571 = vmatpush3.msra.mxu0 %v2199_v38 }
 0x134   :  { %1572 = vmatprep.subr.mxu0 %v1639_v3 }
 0x135   :  { %1573 = vmatpush3.msra.mxu0 %v2200_v39 }
 0x136   :  { %1574 = vmatprep.subr.mxu0 %v1639_v3 }
 0x137   :  { %1575 = vmatpush3.msra.mxu0 %v2201_v40 }
 0x138   :  { %1577 = vmatmul.mubr.f32.vlgmr.msra.gmra.mxu0 %v2017_v49 }
 0x1ae   :  { %v784_v41 = vpop.f32.mrf.mxu1 }
 0x1b0   :  { %v1473_v42 = vpop.f32.mrf.mxu1 }
 0x1b6   :  { %v633_v44 = vpop.f32.mrf.mxu0 }
 0x1b7   :  { %v634_v61 = vadd.f32 %v1205_v58, %v633_v44 }
 0x1b8   :  { %v1438_v51 = vpop.f32.mrf.mxu0 }
 0x1b9   :  { %v785_v3 = vadd.f32 %v784_v41, %v634_v61 }
 0x1ce   :  { %v977_v53 = vpop.f32.mrf.mxu1 }
 0x1d0   :  { %v1543_v54 = vpop.f32.mrf.mxu1 }
 0x1d7   :  { %v888_v56 = vpop.f32.mrf.mxu0 }
 0x1d8   :  { %v889_v4 = vadd.f32 %v888_v56, %v785_v3 }
 0x1d9   :  { %v1508_v57 = vpop.f32.mrf.mxu0 }
 0x1da   :  { %v978_v5 = vadd.f32 %v977_v53, %v889_v4 }
 0x1f0   :  { %v1183_v62 = vpop.f32.mrf.mxu1 }
 0x1f2   :  { %v1613_v63 = vpop.f32.mrf.mxu1 }
 0x1f8   :  { %v1096_v6 = vpop.f32.mrf.mxu0 }
 0x1f9   :  { %v1097_v10 = vadd.f32 %v1096_v6, %v978_v5 }
 0x1fa   :  { %v1578_v11 = vpop.f32.mrf.mxu0 }
 0x1fb   :  { %v1184_v12 = vadd.f32 %v1183_v62, %v1097_v10 }
 0x1fd   :  { %v1187_v16 = vmax.f32 %v1184_v12, 0.0 }
 0x1ff   :  { %1189 = vst.msk [vmem:[#allocation2] sm:$0xff] %vm1188_vm2, %v1187_v16 }
 0x200   :  { %1628 = shalt.err (!%p1625_p4)
}
 0x201   :  { %1199 = dma.vmem_to_hbm [thread:$0]  %s1197_s9, 128, %s2189_s5, [#allocation3]  }
 0x202   :  { %1637 = dma.done.wait [#allocation3], 128  }
 0x203   :  { %1638 = vsyncadd [#allocation3], 4294967168 }
 0x204   :  { %1203 = vsyncpa [#allocation3], 1 }

</bundles_post_ra>
